<compile_context>
chip_gen: v6e
topology: v6e:2x2x1
jax: 0.10.0
libtpu: 0.0.40
codegen_flags: <defaults>
</compile_context>

<pallas_src>
import math

import jax
import jax.numpy as jnp
from jax.experimental import pallas as pl
from jax.experimental.pallas import tpu as pltpu


_FALLBACK_VMEM_BYTES = 64 * 1024 * 1024      # v7x per-TC VMEM (smallest of v5e/v6e/v7x)
_MAX_TILE_BUDGET_BYTES = 24 * 1024 * 1024    # per-output-tile cap on 128 MiB parts
_TARGET_LANES = 2048                         # widen slab rows toward this many lanes


def _vmem_capacity_bytes() -> int:
    """Generation-aware VMEM capacity with a conservative fallback."""
    try:
        return int(pltpu.get_tpu_info().vmem_capacity_bytes)
    except Exception:
        return _FALLBACK_VMEM_BYTES


def _sublane_multiple(dtype) -> int:
    """Packed sublane tile: 8 rows/vreg for 32-bit, 16 for 16-bit, 32 for 8-bit."""
    itemsize = jnp.dtype(dtype).itemsize
    return 8 * max(1, 4 // itemsize)


def _plan_lane_dense_slab(b: int, d: int):
    """Plan a (lanes, rows) lane-dense view of the flat (B*D,) output.

    Returns (lanes, rows) with lanes % 128 == 0 and lanes % d == 0 (so every
    slab row is the bias pattern repeated lanes//d times), or None if no such
    layout exists (trailing-lane stores would then be masked).
    """
    total = b * d
    if d % 128 == 0:
        lanes = d
    else:
        if total % 128 != 0:
            return None
        lanes = d * 128 // math.gcd(d, 128)      # lcm(d, 128)
        if total % lanes != 0:
            return None
    # Widen rows toward _TARGET_LANES for fewer, longer contiguous stores.
    while lanes < _TARGET_LANES and total % (2 * lanes) == 0:
        lanes *= 2
    return lanes, total // lanes


def _blind_tile_kernel(bias_ref, out_ref):
    # bias_ref: (1, L) resident in VMEM (constant block index across the grid).
    # out_ref:  (row_tile, L) output tile.
    # Pure sublane broadcast + full-width vector stores; no MXU/XLU/EUP work.
    out_ref[...] = jnp.broadcast_to(bias_ref[...], out_ref.shape)


def _broadcast_rows(row, n_rows, out_dtype, row_tile):
    """Broadcast a 1-D `row` (length L) to an (n_rows, L) matrix via Pallas."""
    lanes = row.shape[0]
    row2d = row.reshape(1, lanes).astype(out_dtype)
    itemsize = jnp.dtype(out_dtype).itemsize
    row_bytes = lanes * itemsize
    sub = _sublane_multiple(out_dtype)

    vmem_cap = _vmem_capacity_bytes()
    tile_budget = min(_MAX_TILE_BUDGET_BYTES, vmem_cap // 5)

    if row_tile is None:
        # Largest row tile whose double-buffered output fits the budget
        # (no artificial row cap).
        row_tile = min(n_rows, max(sub, tile_budget // row_bytes))
    # Validate / round user- or auto-chosen tile to the packed sublane multiple.
    row_tile = max(sub, (int(row_tile) // sub) * sub)

    def _vmem_limit(tile_bytes):
        limit = max(32 << 20, 2 * tile_bytes + (4 << 20))
        return min(int(vmem_cap * 0.9), limit)

    if row_tile >= n_rows:
        # Single block covering the whole output (block shape == full dims).
        return pl.pallas_call(
            _blind_tile_kernel,
            out_shape=jax.ShapeDtypeStruct((n_rows, lanes), out_dtype),
            in_specs=[pl.BlockSpec((1, lanes), lambda: (0, 0))],
            out_specs=pl.BlockSpec((n_rows, lanes), lambda: (0, 0)),
            compiler_params=pltpu.CompilerParams(
                vmem_limit_bytes=_vmem_limit(n_rows * row_bytes)),
        )(row2d)

    # Tiled path: 1-D grid over rows; bias block index is constant across the
    # grid so the parameter is DMA'd once and stays resident in VMEM.
    return pl.pallas_call(
        _blind_tile_kernel,
        out_shape=jax.ShapeDtypeStruct((n_rows, lanes), out_dtype),
        grid=(pl.cdiv(n_rows, row_tile),),
        in_specs=[pl.BlockSpec((1, lanes), lambda i: (0, 0))],
        out_specs=pl.BlockSpec((row_tile, lanes), lambda i: (i, 0)),
        compiler_params=pltpu.CompilerParams(
            # Independent row tiles; see TODO(synk) re CORE_PARALLEL on v7x.
            dimension_semantics=("parallel",),
            vmem_limit_bytes=_vmem_limit(row_tile * row_bytes)),
    )(row2d)


def blind_tile_embedder(x: jax.Array, bias: jax.Array, *,
                        out_dtype=None, row_tile=None,
                        min_pallas_bytes: int = 1 << 20) -> jax.Array:
    """Pallas equivalent of BlindTileEmbedder.forward.

    Args:
      x:        tile batch, shape (B, C, H, W); only B is consumed (the input
                is intentionally NOT passed into the pallas_call).
      bias:     parameter, shape (out_dim,).
      out_dtype: output dtype (defaults to bias.dtype; bf16 halves writeback).
      row_tile: optional per-step row-tile override (testing / tuning).
      min_pallas_bytes: below this output size, fall back to jnp.broadcast_to.

    Returns:
      (B, out_dim) array: bias broadcast over the batch.
    """
    b = int(x.shape[0])
    d = int(bias.shape[0])
    if out_dtype is None:
        out_dtype = bias.dtype
    out_dtype = jnp.dtype(out_dtype)

    if b * d * out_dtype.itemsize < min_pallas_bytes:
        # pallas_call launch + DMA setup exceeds the work at toy sizes.
        return jnp.broadcast_to(bias.astype(out_dtype)[None, :], (b, d))

    plan = _plan_lane_dense_slab(b, d)
    if plan is not None:
        lanes, rows = plan
        lane_row = jnp.tile(bias, lanes // d) if lanes != d else bias
        out = _broadcast_rows(lane_row, rows, out_dtype, row_tile)
        # Row-major metadata reshape back to (B, D) (copy-free; verify in HLO).
        return out.reshape(b, d)

    # Fallback: no lane-dense layout exists; trailing-lane stores are masked.
    return _broadcast_rows(bias, b, out_dtype, row_tile)


if __name__ == "__main__":
    key = jax.random.PRNGKey(0)
    k_x, k_b = jax.random.split(key)

    # Small shapes consistent with a "tile batch": batch=2, channels=4, 16x16.
    B, C, H, W = 2, 4, 16, 16
    OUT_DIM = 32

    x = jax.random.normal(k_x, (B, C, H, W), dtype=jnp.float32)
    bias = jax.random.normal(k_b, (OUT_DIM,), dtype=jnp.float32)
    ref = jnp.broadcast_to(bias[None, :], (B, OUT_DIM))

    # 1) Default path at toy size: short-circuits to the XLA broadcast.
    out = jax.block_until_ready(blind_tile_embedder(x, bias))
    assert out.shape == (B, OUT_DIM) and out.dtype == jnp.float32
    assert jnp.allclose(out, ref)

    # 2) Force the Pallas kernel on the toy size (direct single-block path).
    out_p = jax.block_until_ready(
        blind_tile_embedder(x, bias, min_pallas_bytes=0))
    assert out_p.shape == (B, OUT_DIM)
    assert jnp.allclose(out_p, ref)

    # 3) Zero-init bias, matching nn.Parameter(torch.zeros(out_dim)).
    zero_bias = jnp.zeros((OUT_DIM,), dtype=jnp.float32)
    out_zero = jax.block_until_ready(
        blind_tile_embedder(x, zero_bias, min_pallas_bytes=0))
    assert jnp.all(out_zero == 0.0)

    # 4) Lane-dense generalized slab (D=96 not a divisor of 128) + tiled grid.
    B2, D2 = 512, 96
    x2 = jnp.zeros((B2, C, H, W), dtype=jnp.float32)   # contents are ignored
    bias2 = jax.random.normal(k_b, (D2,), dtype=jnp.float32)
    out2 = jax.block_until_ready(
        blind_tile_embedder(x2, bias2, min_pallas_bytes=0, row_tile=8))
    assert out2.shape == (B2, D2)
    assert jnp.allclose(out2, jnp.broadcast_to(bias2[None, :], (B2, D2)))

    # 5) bfloat16 output (halves HBM writeback bytes on this write-bound op).
    out_bf16 = jax.block_until_ready(
        blind_tile_embedder(x2, bias2, out_dtype=jnp.bfloat16,
                            min_pallas_bytes=0))
    assert out_bf16.dtype == jnp.bfloat16
    assert jnp.allclose(
        out_bf16,
        jnp.broadcast_to(bias2.astype(jnp.bfloat16)[None, :], (B2, D2)))

    print("KERNEL_OK")
</pallas_src>

<mosaic_0001>
module attributes {stable_mosaic.version = 11 : i64} {
  func.func @_blind_tile_kernel(%arg0: memref<1x32xf32, #tpu.memory_space<vmem>>, %arg1: memref<2x32xf32, #tpu.memory_space<vmem>>) attributes {dimension_semantics = [], scalar_prefetch = 0 : i64, scratch_operands = 0 : i64, tpu.core_type = #tpu.core_type<tc>} {
    %c0 = arith.constant 0 : index
    %c0_0 = arith.constant 0 : index
    %0 = vector.load %arg0[%c0, %c0_0] : memref<1x32xf32, #tpu.memory_space<vmem>>, vector<1x32xf32>
    %1 = vector.shape_cast %0 : vector<1x32xf32> to vector<1x32xf32>
    %2 = vector.broadcast %1 : vector<1x32xf32> to vector<2x32xf32>
    %c0_1 = arith.constant 0 : index
    %c0_2 = arith.constant 0 : index
    %3 = vector.load %arg1[%c0_1, %c0_2] : memref<2x32xf32, #tpu.memory_space<vmem>>, vector<2x32xf32>
    tpu.vector_store %arg1[%c0_1, %c0_2], %2 {strides = array<i32>} : memref<2x32xf32, #tpu.memory_space<vmem>>, vector<2x32xf32>,
    return
  }
}

</mosaic_0001>

<bundles_post_ra>
// kernel: tpu_custom_call.1
= control target key start
LH: loop header
LB: loop body
LE: loop exit
PB: predicated region body
PF: predicated region fallthrough
CT: control target
= control target key end

     0   :  { %6 = vsyncpa [#allocation3], 0  ;;  %s110_s0 = inlined_call_operand.hbm [shape: f32[1,32], index: 0, kind: input, shape index: {}]   ;;  %s111_s1 = inlined_call_operand.hbm [shape: f32[2,32], index: 1, kind: output, shape index: {}]  }
   0x1   :  { %7 = vsyncpa [#allocation4], 0  ;;  %s92_s6 = smov [#allocation2]  }
   0x2   :  { %s14_s7 = sshll.u32 %s92_s6, 4  ;;  %s15_s7 = int_to_ptr.vmem [resolvable:$true] %s14_s7 }
   0x3   :  { %s56_s8 = scalar_lea.vmem %s15_s7, 16  ;;  %s60_s9 = scalar_lea.vmem %s15_s7, 32 }
   0x4   :  { %p57_p0 = scmp.ne.s32.totalorder %s15_s7, %s56_s8  ;;  %p61_p1 = scmp.lt.s32.totalorder %s15_s7, %s15_s7 }
   0x5   :  { %p62_p2 = scmp.lt.s32.totalorder %s60_s9, %s56_s8 }
   0x7   :  { %p63_p3 = por %p62_p2, %p61_p1 }
   0x9   :  { %p64_p4 = pnand %p63_p3, %p57_p0 }
   0xb   :  { %67 = shalt.err (!%p64_p4)
}
   0xc   :  { %17 = dma.hbm_to_vmem [thread:$0]  %s110_s0, 16, %s15_s7, [#allocation3]  }
   0xd   :  { %88 = dma.done.wait [#allocation3], 16  }
   0xe   :  { %89 = vsyncadd [#allocation3], 4294967280  ;;  %s93_s12 = smov [#allocation5]   ;;  %vm28_vm0 = vcmask 254976   ;;  %v45_v0 = vld [vmem:[#allocation2] ss:$0 sm:$0xff] }
   0xf   :  { %s36_s13 = sshll.u32 %s93_s12, 4  ;;  %29 = vst.msk [vmem:[#allocation5] sm:$0x3] %vm28_vm0, %v45_v0  ;;  %s37_s13 = int_to_ptr.vmem [resolvable:$true] %s36_s13 }
  0x10   :  { %s68_s14 = scalar_lea.vmem %s37_s13, 32  ;;  %p73_p6 = scmp.lt.s32.totalorder %s37_s13, %s37_s13 }
  0x11   :  { %p69_p5 = scmp.ne.s32.totalorder %s37_s13, %s68_s14  ;;  %p74_p7 = scmp.lt.s32.totalorder %s68_s14, %s68_s14 }
  0x13   :  { %p75_p8 = por %p74_p7, %p73_p6 }
  0x15   :  { %p76_p9 = pnand %p75_p8, %p69_p5 }
  0x17   :  { %79 = shalt.err (!%p76_p9)
}
  0x18   :  { %39 = dma.vmem_to_hbm [thread:$0]  %s37_s13, 32, %s111_s1, [#allocation4]  }
  0x19   :  { %90 = dma.done.wait [#allocation4], 32  }
  0x1a   :  { %91 = vsyncadd [#allocation4], 4294967264 }
  0x1b   :  { %43 = vsyncpa [#allocation3], 1 }
  0x1c   :  { %44 = vsyncpa [#allocation4], 1 }

</bundles_post_ra>
